<compile_context>
chip_gen: v7x
topology: tpu7x:2x2x1
jax: 0.10.0
libtpu: 0.0.40
codegen_flags: <defaults>
</compile_context>

<pallas_src>
import jax
import jax.numpy as jnp
from jax.experimental import pallas as pl
from jax.experimental.pallas import tpu as pltpu

LANE = 128


def _round_up(n, m):
    return (n + m - 1) // m * m


def _pick_tile_b(batch, row_bytes, *, vmem_budget=8 * 1024 * 1024,
                 min_steps=4, tile_cap=1024):
    """Largest batch tile (multiple of 8, <= tile_cap, double-buffered row
    streams within vmem_budget) dividing `batch` while keeping >= min_steps
    grid steps (>= 2 per TensorCore on v7x). Falls back to the whole batch,
    which is always a legal block shape."""
    cap = min(batch, tile_cap, max(8, vmem_budget // max(row_bytes, 1)))
    cap -= cap % 8
    for t in range(cap, 7, -8):
        if batch % t:
            continue
        # Prefer pipeline depth when the batch is big enough to allow it.
        if batch // t < min_steps and batch >= min_steps * 8:
            continue
        return t
    return batch


def _vmem_limit_bytes():
    # Generation-aware scoped-VMEM cap: conservative on v7x (64 MiB physical,
    # 2 TCs share pressure), roomier on v5e/v6e (128 MiB physical).
    try:
        kind = jax.devices()[0].device_kind.lower()
    except Exception:
        kind = ""
    if "v5" in kind or "v6" in kind:
        return 64 * 1024 * 1024
    return 32 * 1024 * 1024


def _compiler_params(*semantics):
    return pltpu.CompilerParams(
        dimension_semantics=semantics,
        vmem_limit_bytes=_vmem_limit_bytes(),
    )


# --------------------------------------------------------------------------
# Kernels
# --------------------------------------------------------------------------
def _first_model_kernel(x_ref, w_ref, b_ref, o_ref):
    # y = x @ W^T + b   (W pre-transposed/padded to (in, out_pad) at build time)
    y = jnp.dot(x_ref[...], w_ref[...], preferred_element_type=jnp.float32)
    o_ref[...] = (y + b_ref[...]).astype(o_ref.dtype)


def _grownet_kernel(x_ref, w1_ref, b1_ref, w2_ref, b2_ref, prev_ref, o_ref):
    # h = relu(x @ W1^T + b1);  y = h @ W2^T + b2 + prev_output
    h = jnp.dot(x_ref[...], w1_ref[...], preferred_element_type=jnp.float32)
    h = jnp.maximum(h + b1_ref[...], 0.0).astype(w2_ref.dtype)
    y = jnp.dot(h, w2_ref[...], preferred_element_type=jnp.float32)
    o_ref[...] = (y + b2_ref[...] + prev_ref[...].astype(jnp.float32)).astype(o_ref.dtype)


def _grownet_chain_kernel(x_ref, w1_ref, b1_ref, w2_ref, b2_ref, prev_ref, o_ref):
    # Fused boosting chain over a single (batch-tile) grid axis. All stage
    # weights are VMEM-resident (constant index maps); the stage loop is
    # statically unrolled in-kernel, and the running prev_output accumulates in
    # an f32 value that is cast + stored exactly once.
    x = x_ref[...]
    acc = prev_ref[...].astype(jnp.float32)
    n_stages = w1_ref.shape[0]            # static -> unrolled at trace time
    for s in range(n_stages):
        h = jnp.dot(x, w1_ref[s], preferred_element_type=jnp.float32)
        h = jnp.maximum(h + b1_ref[s], 0.0).astype(w2_ref.dtype)
        y = jnp.dot(h, w2_ref[s], preferred_element_type=jnp.float32)
        acc = acc + y + b2_ref[s]
    o_ref[...] = acc.astype(o_ref.dtype)
    # TODO(synk): if W1 is frozen to the looks_linear [I; -I] structure, the
    # first matmul could be replaced by relu(concat([x, -x], -1) + b1) on the VPU.


# --------------------------------------------------------------------------
# Forward wrappers
# --------------------------------------------------------------------------
@jax.jit
def dense_grownet_first_forward(x, w1_t, b1_p):
    """First model. Returns lane-padded (B, out_pad) f32; real cols are [:out]."""
    B, in_size = x.shape
    out_pad = w1_t.shape[1]
    tb = _pick_tile_b(B, 2 * 4 * (in_size + out_pad))
    return pl.pallas_call(
        _first_model_kernel,
        out_shape=jax.ShapeDtypeStruct((B, out_pad), jnp.float32),
        grid=(B // tb,),
        in_specs=[
            pl.BlockSpec((tb, in_size), lambda i: (i, 0)),
            pl.BlockSpec((in_size, out_pad), lambda i: (0, 0)),
            pl.BlockSpec((1, out_pad), lambda i: (0, 0)),
        ],
        out_specs=pl.BlockSpec((tb, out_pad), lambda i: (i, 0)),
        compiler_params=_compiler_params("parallel"),
    )(x, w1_t, b1_p)


@jax.jit
def dense_grownet_forward(x, w1_t, b1_r, w2_t, b2_p, prev_output):
    """One boosted stage. prev_output / output are lane-padded (B, out_pad)."""
    B, in_size = x.shape
    hidden_pad = w1_t.shape[1]
    out_pad = w2_t.shape[1]
    tb = _pick_tile_b(B, 2 * 4 * (in_size + 2 * out_pad))
    return pl.pallas_call(
        _grownet_kernel,
        out_shape=jax.ShapeDtypeStruct((B, out_pad), prev_output.dtype),
        grid=(B // tb,),
        in_specs=[
            pl.BlockSpec((tb, in_size), lambda i: (i, 0)),
            pl.BlockSpec((in_size, hidden_pad), lambda i: (0, 0)),
            pl.BlockSpec((1, hidden_pad), lambda i: (0, 0)),
            pl.BlockSpec((hidden_pad, out_pad), lambda i: (0, 0)),
            pl.BlockSpec((1, out_pad), lambda i: (0, 0)),
            pl.BlockSpec((tb, out_pad), lambda i: (i, 0)),
        ],
        out_specs=pl.BlockSpec((tb, out_pad), lambda i: (i, 0)),
        compiler_params=_compiler_params("parallel"),
    )(x, w1_t, b1_r, w2_t, b2_p, prev_output)


@jax.jit
def dense_grownet_chain_forward(x, w1_all, b1_all, w2_all, b2_all, prev_output):
    """Fused chain of n_stages boosted models in one pallas_call.
    Weight stacks: w1_all (n, in, hidden_pad), b1_all (n, 1, hidden_pad),
    w2_all (n, hidden_pad, out_pad), b2_all (n, 1, out_pad).
    prev_output / output are lane-padded (B, out_pad)."""
    B, in_size = x.shape
    n_stages, _, hidden_pad = w1_all.shape
    out_pad = w2_all.shape[2]
    tb = _pick_tile_b(B, 2 * 4 * (in_size + 2 * out_pad))
    return pl.pallas_call(
        _grownet_chain_kernel,
        out_shape=jax.ShapeDtypeStruct((B, out_pad), prev_output.dtype),
        grid=(B // tb,),
        in_specs=[
            pl.BlockSpec((tb, in_size), lambda i: (i, 0)),
            # Full-extent, constant-index blocks -> weight stacks stay resident.
            pl.BlockSpec((n_stages, in_size, hidden_pad), lambda i: (0, 0, 0)),
            pl.BlockSpec((n_stages, 1, hidden_pad), lambda i: (0, 0, 0)),
            pl.BlockSpec((n_stages, hidden_pad, out_pad), lambda i: (0, 0, 0)),
            pl.BlockSpec((n_stages, 1, out_pad), lambda i: (0, 0, 0)),
            pl.BlockSpec((tb, out_pad), lambda i: (i, 0)),
        ],
        out_specs=pl.BlockSpec((tb, out_pad), lambda i: (i, 0)),
        compiler_params=_compiler_params("parallel"),
    )(x, w1_all, b1_all, w2_all, b2_all, prev_output)


# --------------------------------------------------------------------------
# Deterministic parameter construction (reference + pre-packed kernel copies)
# --------------------------------------------------------------------------
def looks_linear_init(input_size):
    """'looks_linear' init for the (2*input_size, input_size) first layer:
    W = [I; -I] so relu(Wx) preserves the signal (CReLU-style)."""
    eye = jnp.eye(input_size, dtype=jnp.float32)
    return jnp.concatenate([eye, -eye], axis=0)  # (2*in, in)


def make_params(key, input_size, output_size, is_first_model):
    # NOTE(synthetic): the module's 'zero' init would make the hot-path matmuls
    # trivially zero, so zero-initialized layers get small deterministic random
    # weights here to actually exercise the kernel. The 'looks_linear' layer is
    # built exactly per the module spec. Kernel-side copies (pre-transposed to
    # (in, out), lane-padded to 128 in BOTH hidden and output dims) are built
    # once here, not per forward call.
    out_pad = _round_up(output_size, LANE)
    if is_first_model:
        k1, k2 = jax.random.split(key, 2)
        w1 = 0.05 * jax.random.normal(k1, (output_size, input_size), jnp.float32)
        b1 = 0.05 * jax.random.normal(k2, (output_size,), jnp.float32)
        w1_t = jnp.zeros((input_size, out_pad), jnp.float32).at[:, :output_size].set(w1.T)
        b1_p = jnp.zeros((1, out_pad), jnp.float32).at[:, :output_size].set(b1)
        return dict(w1=w1, b1=b1, w1_t=w1_t, b1_p=b1_p)

    hidden = 2 * input_size
    hidden_pad = _round_up(hidden, LANE)
    k1, k2, k3 = jax.random.split(key, 3)
    w1 = looks_linear_init(input_size)                                  # (hidden, in)
    b1 = 0.05 * jax.random.normal(k1, (hidden,), jnp.float32)
    w2 = 0.05 * jax.random.normal(k2, (output_size, hidden), jnp.float32)
    b2 = 0.05 * jax.random.normal(k3, (output_size,), jnp.float32)
    w1_t = jnp.zeros((input_size, hidden_pad), jnp.float32).at[:, :hidden].set(w1.T)
    b1_r = jnp.zeros((1, hidden_pad), jnp.float32).at[:, :hidden].set(b1)
    w2_t = jnp.zeros((hidden_pad, out_pad), jnp.float32).at[:hidden, :output_size].set(w2.T)
    b2_p = jnp.zeros((1, out_pad), jnp.float32).at[:, :output_size].set(b2)
    return dict(w1=w1, b1=b1, w2=w2, b2=b2,
                w1_t=w1_t, b1_r=b1_r, w2_t=w2_t, b2_p=b2_p)


# --------------------------------------------------------------------------
# Pure-JAX reference (mirrors the PyTorch forward)
# --------------------------------------------------------------------------
def ref_first_forward(x, p):
    return x @ p["w1"].T + p["b1"]


def ref_forward(x, p, prev_output):
    h = jnp.maximum(x @ p["w1"].T + p["b1"], 0.0)
    return h @ p["w2"].T + p["b2"] + prev_output


# TODO(synk): extract_features() (hidden-feature tap) is not part of forward();
# it would just be the first matmul + relu of _grownet_kernel if ever needed.

# --------------------------------------------------------------------------
if __name__ == "__main__":
    batch = 512
    input_size = 16
    output_size = 4
    n_stages = 3

    key = jax.random.PRNGKey(0)
    keys = jax.random.split(key, 2 + n_stages)
    kx, kp_first, kp_stages = keys[0], keys[1], keys[2:]

    x = jax.random.normal(kx, (batch, input_size), jnp.float32)

    # --- first model (is_first_model=True, prev_output=None) ---------------
    p_first = make_params(kp_first, input_size, output_size, is_first_model=True)
    y0_pad = jax.block_until_ready(
        dense_grownet_first_forward(x, p_first["w1_t"], p_first["b1_p"]))
    y0 = y0_pad[:, :output_size]
    assert jnp.allclose(y0, ref_first_forward(x, p_first), atol=1e-4, rtol=1e-4), \
        "first-model mismatch"

    # --- one boosted stage (is_first_model=False, prev_output required) ----
    p_stages = [make_params(k, input_size, output_size, is_first_model=False)
                for k in kp_stages]
    p0 = p_stages[0]
    y1_pad = jax.block_until_ready(
        dense_grownet_forward(x, p0["w1_t"], p0["b1_r"],
                              p0["w2_t"], p0["b2_p"], y0_pad))
    y1_ref = ref_forward(x, p0, y0)
    assert jnp.allclose(y1_pad[:, :output_size], y1_ref, atol=1e-4, rtol=1e-4), \
        "boosted-model mismatch"

    # --- fused boosting chain (all stages, one pallas_call, f32 streams) ---
    w1_all = jnp.stack([p["w1_t"] for p in p_stages])   # (n, in, hidden_pad)
    b1_all = jnp.stack([p["b1_r"] for p in p_stages])   # (n, 1, hidden_pad)
    w2_all = jnp.stack([p["w2_t"] for p in p_stages])   # (n, hidden_pad, out_pad)
    b2_all = jnp.stack([p["b2_p"] for p in p_stages])   # (n, 1, out_pad)
    yc_pad = jax.block_until_ready(
        dense_grownet_chain_forward(x, w1_all, b1_all, w2_all, b2_all, y0_pad))

    y_ref = y0
    for p in p_stages:
        y_ref = ref_forward(x, p, y_ref)
    assert jnp.allclose(yc_pad[:, :output_size], y_ref, atol=1e-4, rtol=1e-4), \
        "fused-chain mismatch"

    # --- fused chain with bf16 streams (f32 biases + f32 accumulation) -----
    yc_bf16 = jax.block_until_ready(
        dense_grownet_chain_forward(x.astype(jnp.bfloat16),
                                    w1_all.astype(jnp.bfloat16), b1_all,
                                    w2_all.astype(jnp.bfloat16), b2_all, y0_pad))
    assert jnp.allclose(yc_bf16[:, :output_size], y_ref, atol=3e-2, rtol=3e-2), \
        "bf16 fused-chain mismatch"

    print("KERNEL_OK")
</pallas_src>

<mosaic_0001>
module attributes {stable_mosaic.version = 11 : i64} {
  func.func @_first_model_kernel(%arg0: i32, %arg1: memref<128x16xf32, #tpu.memory_space<vmem>>, %arg2: memref<16x128xf32, #tpu.memory_space<vmem>>, %arg3: memref<1x128xf32, #tpu.memory_space<vmem>>, %arg4: memref<128x128xf32, #tpu.memory_space<vmem>>) attributes {dimension_semantics = [#tpu.dimension_semantics<parallel>], iteration_bounds = array<i64: 4>, scalar_prefetch = 0 : i64, scratch_operands = 0 : i64, tpu.core_type = #tpu.core_type<tc>, window_params = [{transform_indices = @transform_0, window_bounds = array<i64: 128, 16>}, {pipeline_mode = #tpu.pipeline_mode<synchronous>, transform_indices = @transform_1, window_bounds = array<i64: 16, 128>}, {pipeline_mode = #tpu.pipeline_mode<synchronous>, transform_indices = @transform_2, window_bounds = array<i64: 1, 128>}, {transform_indices = @transform_3, window_bounds = array<i64: 128, 128>}]} {
    %c0 = arith.constant 0 : index
    %c0_0 = arith.constant 0 : index
    %0 = vector.load %arg1[%c0, %c0_0] : memref<128x16xf32, #tpu.memory_space<vmem>>, vector<128x16xf32>
    %c0_1 = arith.constant 0 : index
    %c0_2 = arith.constant 0 : index
    %1 = vector.load %arg2[%c0_1, %c0_2] : memref<16x128xf32, #tpu.memory_space<vmem>>, vector<16x128xf32>
    %cst = arith.constant dense<0.000000e+00> : vector<128x128xf32>
    %2 = tpu.matmul %0, %1, %cst {dimension_numbers = #tpu.dot_dimension_numbers<[1], [0], [0], [1], [0, 0, 1, 1], [], []>} : vector<128x16xf32>, vector<16x128xf32>, vector<128x128xf32> -> vector<128x128xf32>
    %c0_3 = arith.constant 0 : index
    %c0_4 = arith.constant 0 : index
    %3 = vector.load %arg3[%c0_3, %c0_4] : memref<1x128xf32, #tpu.memory_space<vmem>>, vector<1x128xf32>
    %4 = vector.broadcast %3 : vector<1x128xf32> to vector<128x128xf32>
    %5 = arith.addf %2, %4 : vector<128x128xf32>
    %c0_5 = arith.constant 0 : index
    %c0_6 = arith.constant 0 : index
    %6 = vector.load %arg4[%c0_5, %c0_6] : memref<128x128xf32, #tpu.memory_space<vmem>>, vector<128x128xf32>
    tpu.vector_store %arg4[%c0_5, %c0_6], %5 {strides = array<i32>} : memref<128x128xf32, #tpu.memory_space<vmem>>, vector<128x128xf32>,
    return
  }
  func.func @transform_0(%arg0: i32) -> (i32, i32) {
    %c0_i32 = arith.constant 0 : i32
    %c0_i32_0 = arith.constant 0 : i32
    return %arg0, %c0_i32 : i32, i32
  }
  func.func @transform_1(%arg0: i32) -> (i32, i32) {
    %c0_i32 = arith.constant 0 : i32
    %c0_i32_0 = arith.constant 0 : i32
    %c0_i32_1 = arith.constant 0 : i32
    return %c0_i32, %c0_i32_0 : i32, i32
  }
  func.func @transform_2(%arg0: i32) -> (i32, i32) {
    %c0_i32 = arith.constant 0 : i32
    %c0_i32_0 = arith.constant 0 : i32
    %c0_i32_1 = arith.constant 0 : i32
    return %c0_i32, %c0_i32_0 : i32, i32
  }
  func.func @transform_3(%arg0: i32) -> (i32, i32) {
    %c0_i32 = arith.constant 0 : i32
    %c0_i32_0 = arith.constant 0 : i32
    return %arg0, %c0_i32 : i32, i32
  }
}

</mosaic_0001>

<bundles_post_ra>
// kernel: dense_grownet_first_forward.1
= control target key start
LH: loop header
LB: loop body
LE: loop exit
PB: predicated region body
PF: predicated region fallthrough
CT: control target
= control target key end

     0   :  { %8 = vsyncpa [#allocation3], 0  ;;  %s843_s0 = inlined_call_operand.vmem [shape: f32[512,16], index: 0, kind: input, shape index: {}]   ;;  %s844_s1 = inlined_call_operand.vmem [shape: f32[16,128], index: 1, kind: input, shape index: {}]   ;;  %s845_s2 = inlined_call_operand.vmem [shape: f32[1,128], index: 2, kind: input, shape index: {}]   ;;  %s846_s3 = inlined_call_operand.hbm [shape: f32[512,128], index: 3, kind: output, shape index: {}]  }
   0x1   :  { %10 = vsyncpa [#allocation3 + $0x1], 0  ;;  %s693_s12 = smov 0   ;;  %s695_s13 = smov 0  }
   0x2   :  { %s697_s14 = smov 0   ;;  %s699_s15 = smov 0  }
   0x3 LB: > { %s714_s16 = sadd.s32 4294967295, %s668_s15   ;;  %s483_s17 = sadd.s32 4294967294, %s668_s15   ;;  %s668_s15 = sphi %s699_s15, %s852_s15   ;;  %s664_s14 = sphi %s697_s14, %s851_s14   ;;  %s660_s13 = sphi %s695_s13, %s850_s13   ;;  %s656_s12 = sphi %s693_s12, %s849_s12  }
   0x4   : > { %s718_s18 = sadd.s32 1, %s668_s15   ;;  %s91_s19 = sadd.s32 1, %s664_s14 }
   0x5   : > { %s88_s20 = ssub.s32 %s668_s15, %s718_s18  ;;  %p101_p0 = scmp.ne.s32.totalorder %s664_s14, %s660_s13 }
   0x6   : > { %p89_p1 = scmp.eq.s32.totalorder %s88_s20, 0  ;;  %p102_p2 = scmp.eq.s32.totalorder %s714_s16, 3 }
   0x7   : > { %p107_p3 = scmp.ne.s32.totalorder %s660_s13, %s656_s12  ;;  %p108_p4 = scmp.eq.s32.totalorder %s483_s17, 3 }
   0x8   : > { %s729_s21 = scalar_select %p89_p1, %s664_s14, %s91_s19  }
   0x9   : > { %p731_p5 = por %p102_p2, %p101_p0  ;;  %p735_p6 = por %p108_p4, %p107_p3 }
   0xa   : > { %p486_p7 = scmp.ge.s32.totalorder %s668_s15, 1  ;;  %p141_p8 = scmp.lt.s32.totalorder %s668_s15, 5 }
   0xc   : > { %p142_p9 = pnand %p486_p7, %p141_p8 }
   0xd   : > { %v188_v0 = vld [vmem:[%s844_s1] sm:$0xff] (!%p142_p9)  ;;  %v189_v1 = vld [vmem:[%s844_s1 + $0x8] sm:$0xff] (!%p142_p9)  ;;  %s488_s28 = sshll.u32 (!%p142_p9), %s714_s16, 4  ;;  %vm197_vm0 = vcmask (!%p142_p9), 130048   ;;  %s162_s6 = sand.u32 (!%p142_p9), 1, %s660_s13  }
   0xe   : > { %145 = sbr.rel (%p142_p9) target bundleno = 269 (0x10d), region = 32  ;;  %v559_v2 = vpack.c.bf16 (!%p142_p9), %v189_v1, %v188_v0  ;;  %p166_p10 = scmp.lt.s32.totalorder (!%p142_p9), %s488_s28, 63  ;;  %v490_v19 = vld [vmem:[%s845_s2] ss:$0 sm:$0xff] (!%p142_p9) }
   0xf   : > { %s487_s7 = sshll.u32 (!%p142_p9), %s162_s6, 7  ;;  %s512_s11 = sshll.u32 (!%p142_p9), %s714_s16, 11 }
  0x10   : > { %560 = vmatprep.subr.bf16.mxu0 (!%p142_p9), %v559_v2  ;;  %563 = vmatprep.subr.bf16.mxu1 (!%p142_p9), %v559_v2  ;;  %s773_s10 = scalar_lea.vmem (!%p142_p9), [#allocation2], %s487_s7  ;;  %s792_s16 = scalar_lea.hbm (!%p142_p9), %s846_s3, %s512_s11 }
  0x11   : > { %562 = vmatpush3.bf16.msra.mxu0 (!%p142_p9), %v559_v2  ;;  %564 = vmatpush3.bf16.msra.mxu1 (!%p142_p9), %v559_v2  ;;  %s421_s17 = sshll.u32 (!%p142_p9), %s773_s10, 4  ;;  %s802_s24 = scalar_lea.sflag (!%p142_p9), [#allocation3], %s162_s6  ;;  %s794_s17 = int_to_ptr.vmem [resolvable:$true] %s421_s17 }
  0x12   : > { %s606_s25 = scalar_lea.vmem (!%p142_p9), %s794_s17, 2048  ;;  %s670_s26 = smov (!%p142_p9), [#allocation2]  }
  0x13   : > { %p607_p11 = scmp.ne.s32.totalorder (!%p142_p9), %s794_s17, %s606_s25  ;;  %s610_s27 = sshll.u32 (!%p142_p9), %s670_s26, 4  ;;  %s611_s27 = int_to_ptr.vmem [resolvable:$false] %s610_s27 }
  0x14   : > { %p613_p0 = scmp.lt.s32.totalorder (!%p142_p9), %s794_s17, %s611_s27 }
  0x15   : > { %s854_s28 = smov (!%p166_p10, %s488_s28), 63  ;;  %p608_p12 = pnand %p607_p11, %p731_p5 }
  0x16   : > { %s489_s29 = sshll.u32 %s854_s28, 3  ;;  %s612_s28 = scalar_lea.vmem %s611_s27, 4096 }
  0x17   : > { %s169_s5 = scalar_lea.vmem %s843_s0, %s489_s29  ;;  %p609_p13 = pneg %p608_p12 }
  0x18   : > { %v172_v3 = vld [vmem:[%s169_s5] sm:$0xff]  ;;  %v173_v5 = vld [vmem:[%s169_s5 + $0x8] sm:$0xff]  ;;  %v174_v7 = vld [vmem:[%s169_s5 + $0x10] sm:$0xff]  ;;  %p614_p1 = scmp.lt.s32.totalorder %s612_s28, %s606_s25 }
  0x19   : > { %v180_v4 = vld [vmem:[%s169_s5 + $0x40] sm:$0xff]  ;;  %535 = vmatprep.mubr.msk.f32.mxu0 %vm197_vm0, %v172_v3  ;;  %v181_v6 = vld [vmem:[%s169_s5 + $0x48] sm:$0xff]  ;;  %v182_v8 = vld [vmem:[%s169_s5 + $0x50] sm:$0xff] }
  0x1a   : > { %547 = vmatprep.mubr.msk.f32.mxu1 %vm197_vm0, %v180_v4  ;;  %536 = vmatmul.mubr.msk.f32.vlgmr.msra.gmra.mrb[0].mxu0 %vm197_vm0, %v173_v5  ;;  %v175_v9 = vld [vmem:[%s169_s5 + $0x18] sm:$0xff]  ;;  %v176_v11 = vld [vmem:[%s169_s5 + $0x20] sm:$0xff]  ;;  %v177_v13 = vld [vmem:[%s169_s5 + $0x28] sm:$0xff]  ;;  %p615_p2 = por %p614_p1, %p613_p0 }
  0x1b   : > { %548 = vmatmul.mubr.msk.f32.vlgmr.msra.gmra.mrb[0].mxu1 %vm197_vm0, %v181_v6  ;;  %538 = vmatprep.mubr.msk.f32.mxu0 %vm197_vm0, %v174_v7  ;;  %v183_v10 = vld [vmem:[%s169_s5 + $0x58] sm:$0xff]  ;;  %v184_v12 = vld [vmem:[%s169_s5 + $0x60] sm:$0xff]  ;;  %v185_v14 = vld [vmem:[%s169_s5 + $0x68] sm:$0xff] }
  0x1c   : > { %550 = vmatprep.mubr.msk.f32.mxu1 %vm197_vm0, %v182_v8  ;;  %v178_v15 = vld [vmem:[%s169_s5 + $0x30] sm:$0xff]  ;;  %v179_v17 = vld [vmem:[%s169_s5 + $0x38] sm:$0xff]  ;;  %p616_p3 = pnand %p615_p2, %p609_p13 }
  0x1d   : > { %v186_v16 = vld [vmem:[%s169_s5 + $0x70] sm:$0xff]  ;;  %v187_v18 = vld [vmem:[%s169_s5 + $0x78] sm:$0xff] }
  0x1e   : > { %539 = vmatmul.mubr.msk.f32.gmra.mrb[2].mxu0 %vm197_vm0, %v175_v9 }
  0x1f   : > { %551 = vmatmul.mubr.msk.f32.gmra.mrb[2].mxu1 %vm197_vm0, %v183_v10  ;;  %541 = vmatprep.mubr.msk.f32.mxu0 %vm197_vm0, %v176_v11 }
  0x20   : > { %553 = vmatprep.mubr.msk.f32.mxu1 %vm197_vm0, %v184_v12 }
  0x22   : > { %542 = vmatmul.mubr.msk.f32.gmra.mrb[4].mxu0 %vm197_vm0, %v177_v13 }
  0x23   : > { %554 = vmatmul.mubr.msk.f32.gmra.mrb[4].mxu1 %vm197_vm0, %v185_v14  ;;  %544 = vmatprep.mubr.msk.f32.mxu0 %vm197_vm0, %v178_v15 }
  0x24   : > { %556 = vmatprep.mubr.msk.f32.mxu1 %vm197_vm0, %v186_v16 }
  0x26   : > { %545 = vmatmul.mubr.msk.f32.gmra.mrb[6].mxu0 %vm197_vm0, %v179_v17 }
  0x27   : > { %557 = vmatmul.mubr.msk.f32.gmra.mrb[6].mxu1 %vm197_vm0, %v187_v18 }
  0xed   : > { %v537_v20 = vpop.f32.mrb[0].mxu0 }
  0xee   : > { %v549_v21 = vpop.f32.mrb[0].mxu1  ;;  %v318_v22 = vadd.f32 %v537_v20, %v490_v19  ;;  %v312_v24 = vpop.f32.mrb[1].mxu0 }
  0xef   : > { %v358_v23 = vadd.f32 %v549_v21, %v490_v19  ;;  %v352_v25 = vpop.f32.mrb[1].mxu1  ;;  %v313_v26 = vadd.f32 %v490_v19, %v312_v24 }
  0xf0   : > { %v353_v27 = vadd.f32 %v490_v19, %v352_v25  ;;  %392 = vst [vmem:[%s773_s10 + $0x8] sm:$0xff] %v318_v22 }
  0xf1   : > { %400 = vst [vmem:[%s773_s10 + $0x48] sm:$0xff] %v358_v23  ;;  %391 = vst [vmem:[%s773_s10] sm:$0xff] %v313_v26  ;;  %v540_v28 = vpop.f32.mrb[2].mxu0 }
  0xf2   : > { %399 = vst [vmem:[%s773_s10 + $0x40] sm:$0xff] %v353_v27  ;;  %v552_v29 = vpop.f32.mrb[2].mxu1  ;;  %v328_v30 = vadd.f32 %v540_v28, %v490_v19  ;;  %v322_v32 = vpop.f32.mrb[3].mxu0 }
  0xf3   : > { %v368_v31 = vadd.f32 %v552_v29, %v490_v19  ;;  %v362_v33 = vpop.f32.mrb[3].mxu1  ;;  %v323_v34 = vadd.f32 %v490_v19, %v322_v32 }
  0xf4   : > { %v363_v35 = vadd.f32 %v490_v19, %v362_v33  ;;  %394 = vst [vmem:[%s773_s10 + $0x18] sm:$0xff] %v328_v30 }
  0xf5   : > { %402 = vst [vmem:[%s773_s10 + $0x58] sm:$0xff] %v368_v31  ;;  %393 = vst [vmem:[%s773_s10 + $0x10] sm:$0xff] %v323_v34  ;;  %v543_v36 = vpop.f32.mrb[4].mxu0 }
  0xf6   : > { %401 = vst [vmem:[%s773_s10 + $0x50] sm:$0xff] %v363_v35  ;;  %v555_v37 = vpop.f32.mrb[4].mxu1  ;;  %v338_v38 = vadd.f32 %v543_v36, %v490_v19  ;;  %v332_v40 = vpop.f32.mrb[5].mxu0 }
  0xf7   : > { %v378_v39 = vadd.f32 %v555_v37, %v490_v19  ;;  %v372_v41 = vpop.f32.mrb[5].mxu1  ;;  %v333_v42 = vadd.f32 %v490_v19, %v332_v40 }
  0xf8   : > { %v373_v43 = vadd.f32 %v490_v19, %v372_v41  ;;  %396 = vst [vmem:[%s773_s10 + $0x28] sm:$0xff] %v338_v38 }
  0xf9   : > { %404 = vst [vmem:[%s773_s10 + $0x68] sm:$0xff] %v378_v39  ;;  %395 = vst [vmem:[%s773_s10 + $0x20] sm:$0xff] %v333_v42  ;;  %v546_v44 = vpop.f32.mrb[6].mxu0 }
  0xfa   : > { %403 = vst [vmem:[%s773_s10 + $0x60] sm:$0xff] %v373_v43  ;;  %v558_v45 = vpop.f32.mrb[6].mxu1  ;;  %v348_v46 = vadd.f32 %v546_v44, %v490_v19  ;;  %v342_v48 = vpop.f32.mrb[7].mxu0 }
  0xfb   : > { %v388_v47 = vadd.f32 %v558_v45, %v490_v19  ;;  %v382_v49 = vpop.f32.mrb[7].mxu1  ;;  %v343_v50 = vadd.f32 %v490_v19, %v342_v48 }
  0xfc   : > { %v383_v51 = vadd.f32 %v490_v19, %v382_v49  ;;  %398 = vst [vmem:[%s773_s10 + $0x38] sm:$0xff] %v348_v46 }
  0xfd   : > { %406 = vst [vmem:[%s773_s10 + $0x78] sm:$0xff] %v388_v47  ;;  %397 = vst [vmem:[%s773_s10 + $0x30] sm:$0xff] %v343_v50 }
  0xfe   : > { %405 = vst [vmem:[%s773_s10 + $0x70] sm:$0xff] %v383_v51 }
  0xff   : > { %619 = shalt.err (!%p616_p3)
}
 0x100   : > { %s620_s29 = scalar_lea.hbm %s792_s16, 2048  ;;  %s624_s5 = scalar_lea.hbm %s846_s3, 8192 }
 0x101   : > { %p621_p4 = scmp.ne.s32.totalorder %s792_s16, %s620_s29  ;;  %p625_p9 = scmp.lt.u32.totalorder %s792_s16, %s846_s3 }
 0x102   : > { %p626_p10 = scmp.lt.u32.totalorder %s624_s5, %s620_s29  ;;  %p628_p12 = scmp.lt.u32.totalorder %s620_s29, %s792_s16 }
 0x103   : > { %p622_p7 = pnand %p621_p4, %p731_p5 }
 0x104   : > { %p627_p11 = por %p626_p10, %p625_p9 }
 0x105   : > { %p623_p8 = pneg %p622_p7 }
 0x106   : > { %p629_p13 = por %p628_p12, %p627_p11 }
 0x108   : > { %p630_p0 = pnand %p629_p13, %p623_p8 }
 0x10a   : > { %633 = shalt.err (!%p630_p0)
}
 0x10b   : > { %s671_s8 = smov 128   ;;  %s672_s9 = smov 8  }
 0x10c   : > { %565 = dma.vmem_to_hbm [thread:$0]  (%p731_p5), %s794_s17, 2048, %s792_s16, %s802_s24, %s671_s8, %s671_s8, %s672_s9  }
 0x10d PF: > { %p571_p1 = scmp.ge.s32.totalorder %s668_s15, 2  ;;  %s436_s10 = sand.u32 1, %s656_s12  }
 0x10e   : > { %s437_s11 = scalar_lea.sflag [#allocation3], %s436_s10 }
 0x10f   : > { %p568_p2 = pnand %p571_p1, %p735_p6 }
 0x111   : > { %651 = dma.done.wait (!%p568_p2), %s437_s11, 2048  }
 0x112   : > { %653 = vsyncadd (!%p568_p2), %s437_s11, 4294965248  ;;  %p13_p3 = scmp.ge.s32.totalorder %s718_s18, 6   ;;  %s849_s12 = smov %s660_s13 }
 0x113   : > { %s850_s13 = smov %s664_s14  ;;  %s851_s14 = smov %s729_s21 }
 0x114   : > { %s852_s15 = smov %s718_s18  ;;  %15 = sbr.rel (!%p13_p3) target bundleno = 3 (0x3), region = 67 }
 0x11b   :  { %442 = vsyncpa [#allocation3], 1 }
 0x11c   :  { %444 = vsyncpa [#allocation3 + $0x1], 1 }

</bundles_post_ra>
